<compile_context>
chip_gen: v7x
topology: tpu7x:2x2x1
jax: 0.10.0
libtpu: 0.0.40
codegen_flags: <defaults>
</compile_context>

<pallas_src>
import math

import jax
import jax.numpy as jnp
from jax.experimental import pallas as pl
from jax.experimental.pallas import tpu as pltpu


_EPS = 1e-8
_TILE_BYTE_BUDGET = 2 << 20      # ~2 MiB per input-tile buffer (~85% HBM roofline)
_SMALL_INPUT_BYTES = 1 << 20     # below this: plain jnp, let XLA fuse it
_FLATTEN_UNIT_CAP = 2048         # max row granularity for the lane-dense flatten
_VMEM_LIMIT_BYTES = 32 << 20     # safe on v5e/v6e/v7x


def _affine_kernel(x_ref, sb_ref, o_ref):
    # y = x * scale + bias.  sb_ref[0] = scale, sb_ref[1] = bias; it is either a
    # full (tb, 128) pre-tiled constant block (lane-dense flatten path) or a
    # (1, D) row broadcast over the (tb, D) batch tile.
    o_ref[...] = (x_ref[...] * sb_ref[0] + sb_ref[1]).astype(o_ref.dtype)


def make_normalizer_scale_bias(mean, var, eps=_EPS):
    """Pre-fold frozen (mean, var) buffers into an affine (scale, bias).

    (x - mean) * rsqrt(var + eps) == x * scale + bias
    with scale = rsqrt(var + eps), bias = -mean * scale.  Computed once outside
    the kernel (the normalizer buffers are frozen / require_grad=False).
    Accepts (D,) or (1, D) buffers.
    """
    mean = jnp.asarray(mean, jnp.float32).reshape(1, -1)
    var = jnp.asarray(var, jnp.float32).reshape(1, -1)
    scale = jax.lax.rsqrt(var + eps)
    bias = -mean * scale
    return scale, bias


def _round_down(n, m):
    return (n // m) * m


def _pick_row_tile(n_rows, row_bytes, unit):
    """Row tile: a multiple of `unit`, capped by a per-buffer byte budget and by
    ~n_rows/2 (so the grid has >= 2 steps and both v7x TensorCores stream).
    Falls back to the whole array as a single block when n_rows is tiny (a
    block equal to the full array dims is always legal)."""
    budget = max(unit, _round_down(_TILE_BYTE_BUDGET // max(row_bytes, 1), unit))
    half = _round_down(n_rows // 2, unit)
    if half < unit:
        return n_rows
    return min(budget, half)


def make_affine_apply(scale, bias, shape, dtype, *, force_pallas=False):
    """Build `x -> x * scale + bias` specialized to a fixed input (shape, dtype).

    Returns either a fused-XLA lambda (small inputs) or a Pallas closure with
    the lane-dense repack and packed scale/bias constants precomputed once.
    """
    shape = tuple(shape)
    dtype = jnp.dtype(dtype)
    D = shape[-1]
    B = 1
    for s in shape[:-1]:
        B *= s
    itemsize = dtype.itemsize
    compute_dtype = jnp.bfloat16 if dtype == jnp.dtype(jnp.bfloat16) else jnp.float32
    scale_c = scale.astype(compute_dtype)
    bias_c = bias.astype(compute_dtype)

    if B * D * itemsize < _SMALL_INPUT_BYTES and not force_pallas:
        # Dispatch + per-step overhead would dominate; let XLA fuse the affine.
        def apply_xla(x):
            y = x.reshape(B, D).astype(compute_dtype) * scale_c + bias_c
            return y.astype(dtype).reshape(shape)
        return apply_xla

    # ---------------- layout plan ----------------
    mode = "bcast"
    rows, cols, P, unit = B, D, 1, 8
    if D % 128 != 0:
        g = math.gcd(D, 128)
        p = D // g                            # == lcm(D, 128) // 128
        u = (8 * p) // math.gcd(8, p)         # == lcm(8, p)
        if (B * D) % 128 == 0 and u <= _FLATTEN_UNIT_CAP:
            mode, rows, cols, P, unit = "flat", (B * D) // 128, 128, p, u

    if mode == "flat":
        tb = _pick_row_tile(rows, cols * itemsize, unit)
        period = P * 128                      # == lcm(D, 128) elements

        def _tile_rows(v):                    # (1, D) -> (tb, 128) pattern block
            pat = jnp.tile(v.reshape(-1), (period // D,)).reshape(P, 128)
            reps = -(-tb // P)
            return jnp.tile(pat, (reps, 1))[:tb]

        sb = jnp.stack([_tile_rows(scale_c), _tile_rows(bias_c)])   # (2, tb, 128)
        sb_block = (2, tb, 128)
    else:
        tb = _pick_row_tile(rows, cols * itemsize, 8)
        sb = jnp.stack([scale_c, bias_c])                           # (2, 1, D)
        sb_block = (2, 1, cols)

    grid = (pl.cdiv(rows, tb),)
    bytes_io = 2 * B * D * itemsize + sb.size * sb.dtype.itemsize

    call = pl.pallas_call(
        _affine_kernel,
        out_shape=jax.ShapeDtypeStruct((rows, cols), dtype),
        grid=grid,
        in_specs=[
            pl.BlockSpec((tb, cols), lambda i: (i, 0),
                         memory_space=pltpu.MemorySpace.VMEM),
            pl.BlockSpec(sb_block, lambda i: (0, 0, 0),
                         memory_space=pltpu.MemorySpace.VMEM),
        ],
        out_specs=pl.BlockSpec((tb, cols), lambda i: (i, 0),
                               memory_space=pltpu.MemorySpace.VMEM),
        compiler_params=pltpu.CompilerParams(
            dimension_semantics=("parallel",),
            vmem_limit_bytes=_VMEM_LIMIT_BYTES),
        cost_estimate=pl.CostEstimate(
            flops=2 * B * D, transcendentals=0, bytes_accessed=bytes_io),
    )

    def apply_pallas(x):
        out = call(x.reshape(rows, cols), sb)
        return out.reshape(shape)

    return apply_pallas


def normalizer_apply(x, scale, bias, *, force_pallas=False):
    """Convenience one-shot wrapper (the module caches the built closure)."""
    return make_affine_apply(scale, bias, x.shape, x.dtype,
                             force_pallas=force_pallas)(x)


class NetworkBasePallas:
    """JAX/Pallas mirror of NetworkBase.

    The normalizer's (mean, var) buffers are frozen (require_grad=False in the
    reference); they are folded once into (scale, bias) at construction, and
    the per-input-shape packed constants / Pallas closure are cached.
    """

    def __init__(self, num_input_dim, num_output_dim, orthogonal_init=False,
                 normalizer_params=None, eps=_EPS):
        self.orthogonal_init = orthogonal_init
        self.num_input_dim = num_input_dim
        self.num_output_dim = num_output_dim
        self._norm_cache = {}
        if normalizer_params is not None:
            mean, var = normalizer_params
            self.norm_scale, self.norm_bias = make_normalizer_scale_bias(mean, var, eps)
        else:
            self.norm_scale = None
            self.norm_bias = None

    def __call__(self, x):
        return self.forward(x)

    def forward(self, x):
        if self.norm_scale is not None:
            key = (tuple(x.shape), jnp.dtype(x.dtype).name)
            fn = self._norm_cache.get(key)
            if fn is None:
                fn = make_affine_apply(self.norm_scale, self.norm_bias,
                                       x.shape, x.dtype)
                self._norm_cache[key] = fn
            x = fn(x)
        return self.pure_forward(x)

    def pure_forward(self, x):
        # TODO(synk): NetworkBase.pure_forward is abstract (raises
        # NotImplementedError in the reference).  A concrete subclass should
        # fold (norm_scale, norm_bias) into its first linear layer
        # (W' = scale[:, None] * W, b' = b + bias @ W) and skip the normalizer
        # pass entirely; here the normalized tensor is returned unchanged.
        return x


def _ref_norm(x, mean, var, eps=_EPS):
    mean = jnp.asarray(mean, jnp.float32).reshape(1, -1)
    var = jnp.asarray(var, jnp.float32).reshape(1, -1)
    return (x - mean) / jnp.sqrt(var + eps)


if __name__ == "__main__":
    key = jax.random.PRNGKey(0)
    batch, num_input_dim, num_output_dim = 8, 32, 16

    kx, km, kv = jax.random.split(key, 3)
    x = jax.random.normal(kx, (batch, num_input_dim), dtype=jnp.float32)
    mean = jax.random.normal(km, (num_input_dim,), dtype=jnp.float32) * 0.5
    var = jax.nn.softplus(
        jax.random.normal(kv, (num_input_dim,), dtype=jnp.float32)) + 0.1

    net = NetworkBasePallas(num_input_dim, num_output_dim,
                            orthogonal_init=False,
                            normalizer_params=(mean, var))

    # (1) Pallas kernel exercised explicitly at the small shape (force_pallas
    #     bypasses the small-input XLA fallback): (8,32) -> lane-dense (2,128).
    out_k = normalizer_apply(x, net.norm_scale, net.norm_bias, force_pallas=True)
    out_k = jax.block_until_ready(out_k)
    assert out_k.shape == (batch, num_input_dim)
    assert jnp.allclose(out_k, _ref_norm(x, mean, var), atol=1e-5, rtol=1e-5)

    # (2) Module forward at the small shape -> fused-XLA fallback path.
    out = jax.block_until_ready(net.forward(x))
    assert jnp.allclose(out, _ref_norm(x, mean, var), atol=1e-5, rtol=1e-5)

    # (3) Larger batch -> Pallas path, lane-dense flatten (2048,128), 2 grid steps.
    xb = jax.random.normal(jax.random.PRNGKey(1), (8192, num_input_dim),
                           dtype=jnp.float32)
    outb = jax.block_until_ready(net.forward(xb))
    assert jnp.allclose(outb, _ref_norm(xb, mean, var), atol=1e-5, rtol=1e-5)

    # (4) Feature dim that does not divide 128 (D=48) -> period-tiled lane-dense
    #     flatten (3072,128) instead of masked 48-lane stores.
    d2 = 48
    x2 = jax.random.normal(jax.random.PRNGKey(2), (8192, d2), dtype=jnp.float32)
    m2 = jax.random.normal(jax.random.PRNGKey(3), (d2,), dtype=jnp.float32) * 0.5
    v2 = jax.nn.softplus(
        jax.random.normal(jax.random.PRNGKey(4), (d2,), dtype=jnp.float32)) + 0.1
    net2 = NetworkBasePallas(d2, num_output_dim, normalizer_params=(m2, v2))
    out2 = jax.block_until_ready(net2.forward(x2))
    assert jnp.allclose(out2, _ref_norm(x2, m2, v2), atol=1e-5, rtol=1e-5)

    print("KERNEL_OK")
</pallas_src>

<mosaic_0001>
module attributes {stable_mosaic.version = 11 : i64} {
  func.func @_affine_kernel(%arg0: i32, %arg1: memref<2x128xf32, #tpu.memory_space<vmem>>, %arg2: memref<2x2x128xf32, #tpu.memory_space<vmem>>, %arg3: memref<2x128xf32, #tpu.memory_space<vmem>>) attributes {dimension_semantics = [#tpu.dimension_semantics<parallel>], iteration_bounds = array<i64: 1>, scalar_prefetch = 0 : i64, scratch_operands = 0 : i64, tpu.core_type = #tpu.core_type<tc>, window_params = [{transform_indices = @transform_0, window_bounds = array<i64: 2, 128>}, {pipeline_mode = #tpu.pipeline_mode<synchronous>, transform_indices = @transform_1, window_bounds = array<i64: 2, 2, 128>}, {transform_indices = @transform_2, window_bounds = array<i64: 2, 128>}]} {
    %c0 = arith.constant 0 : index
    %c0_0 = arith.constant 0 : index
    %0 = vector.load %arg1[%c0, %c0_0] : memref<2x128xf32, #tpu.memory_space<vmem>>, vector<2x128xf32>
    %c0_1 = arith.constant 0 : index
    %c0_2 = arith.constant 0 : index
    %c0_3 = arith.constant 0 : index
    %1 = vector.load %arg2[%c0_1, %c0_2, %c0_3] : memref<2x2x128xf32, #tpu.memory_space<vmem>>, vector<1x2x128xf32>
    %2 = vector.shape_cast %1 : vector<1x2x128xf32> to vector<2x128xf32>
    %3 = arith.mulf %0, %2 : vector<2x128xf32>
    %c1 = arith.constant 1 : index
    %c0_4 = arith.constant 0 : index
    %c0_5 = arith.constant 0 : index
    %4 = vector.load %arg2[%c1, %c0_4, %c0_5] : memref<2x2x128xf32, #tpu.memory_space<vmem>>, vector<1x2x128xf32>
    %5 = vector.shape_cast %4 : vector<1x2x128xf32> to vector<2x128xf32>
    %6 = arith.addf %3, %5 : vector<2x128xf32>
    %c0_6 = arith.constant 0 : index
    %c0_7 = arith.constant 0 : index
    %7 = vector.load %arg3[%c0_6, %c0_7] : memref<2x128xf32, #tpu.memory_space<vmem>>, vector<2x128xf32>
    tpu.vector_store %arg3[%c0_6, %c0_7], %6 {strides = array<i32>} : memref<2x128xf32, #tpu.memory_space<vmem>>, vector<2x128xf32>,
    return
  }
  func.func @transform_0(%arg0: i32) -> (i32, i32) {
    %c0_i32 = arith.constant 0 : i32
    %c0_i32_0 = arith.constant 0 : i32
    return %arg0, %c0_i32 : i32, i32
  }
  func.func @transform_1(%arg0: i32) -> (i32, i32, i32) {
    %c0_i32 = arith.constant 0 : i32
    %c0_i32_0 = arith.constant 0 : i32
    %c0_i32_1 = arith.constant 0 : i32
    %c0_i32_2 = arith.constant 0 : i32
    return %c0_i32, %c0_i32_0, %c0_i32_1 : i32, i32, i32
  }
  func.func @transform_2(%arg0: i32) -> (i32, i32) {
    %c0_i32 = arith.constant 0 : i32
    %c0_i32_0 = arith.constant 0 : i32
    return %arg0, %c0_i32 : i32, i32
  }
}

</mosaic_0001>

<bundles_post_ra>
// kernel: tpu_custom_call.1
= control target key start
LH: loop header
LB: loop body
LE: loop exit
PB: predicated region body
PF: predicated region fallthrough
CT: control target
= control target key end

     0   :  { %7 = vsyncpa [#allocation3], 0  ;;  %s201_s0 = inlined_call_operand.hbm [shape: f32[2,128], index: 0, kind: input, shape index: {}]   ;;  %s202_s1 = inlined_call_operand.hbm [shape: f32[2,2,128], index: 1, kind: input, shape index: {}]   ;;  %s203_s2 = inlined_call_operand.hbm [shape: f32[2,128], index: 2, kind: output, shape index: {}]  }
   0x1   :  { %8 = vsyncpa [#allocation6], 0 }
   0x2   :  { %9 = vsyncpa [#allocation4], 0  ;;  %s138_s9 = smov [#allocation2]   ;;  %s139_s11 = smov [#allocation5]  }
   0x3   :  { %s16_s10 = sshll.u32 %s138_s9, 4  ;;  %s25_s12 = sshll.u32 %s139_s11, 4  ;;  %s17_s10 = int_to_ptr.vmem [resolvable:$true] %s16_s10  ;;  %s158_s12 = int_to_ptr.vmem [resolvable:$true] %s25_s12 }
   0x4   :  { %s66_s15 = scalar_lea.hbm %s201_s0, 32 }
   0x5   :  { %p67_p0 = scmp.ne.s32.totalorder %s201_s0, %s66_s15  ;;  %p70_p1 = scmp.lt.u32.totalorder %s66_s15, %s201_s0 }
   0x7   :  { %p72_p2 = pnand %p70_p1, %p67_p0 }
   0x9   :  { %75 = shalt.err (!%p72_p2)
}
   0xa   :  { %s76_s20 = scalar_lea.vmem %s17_s10, 32  ;;  %p81_p4 = scmp.lt.s32.totalorder %s17_s10, %s17_s10 }
   0xb   :  { %p77_p3 = scmp.ne.s32.totalorder %s17_s10, %s76_s20  ;;  %p82_p5 = scmp.lt.s32.totalorder %s76_s20, %s76_s20 }
   0xd   :  { %p83_p6 = por %p82_p5, %p81_p4 }
   0xf   :  { %p84_p7 = pnand %p83_p6, %p77_p3 }
  0x11   :  { %87 = shalt.err (!%p84_p7)
}
  0x12   :  { %19 = dma.hbm_to_vmem [thread:$0]  %s201_s0, 32, %s17_s10, [#allocation3]  }
  0x13   :  { %s88_s25 = scalar_lea.hbm %s202_s1, 64 }
  0x14   :  { %p89_p8 = scmp.ne.s32.totalorder %s202_s1, %s88_s25  ;;  %p92_p9 = scmp.lt.u32.totalorder %s88_s25, %s202_s1 }
  0x16   :  { %p94_p10 = pnand %p92_p9, %p89_p8 }
  0x18   :  { %97 = shalt.err (!%p94_p10)
}
  0x19   :  { %s98_s30 = scalar_lea.vmem %s158_s12, 64  ;;  %p103_p12 = scmp.lt.s32.totalorder %s158_s12, %s158_s12 }
  0x1a   :  { %p99_p11 = scmp.ne.s32.totalorder %s158_s12, %s98_s30  ;;  %p104_p13 = scmp.lt.s32.totalorder %s98_s30, %s98_s30 }
  0x1c   :  { %p105_p0 = por %p104_p13, %p103_p12 }
  0x1e   :  { %p106_p1 = pnand %p105_p0, %p99_p11 }
  0x20   :  { %109 = shalt.err (!%p106_p1)
}
  0x21   :  { %s140_s0 = smov 32   ;;  %s141_s3 = smov 2  }
  0x22   :  { %31 = dma.hbm_to_vmem [thread:$0]  %s202_s1, 64, %s158_s12, [#allocation6], %s140_s0, %s140_s0, %s141_s3  }
  0x23   :  { %132 = dma.done.wait [#allocation3], 32  }
  0x24   :  { %133 = vsyncadd [#allocation3], 4294967264 }
  0x25   :  { %134 = dma.done.wait [#allocation6], 64  }
  0x26   :  { %135 = vsyncadd [#allocation6], 4294967232  ;;  %s142_s6 = smov [#allocation7]   ;;  %v38_v0 = vld [vmem:[#allocation2] sm:$0x3] }
  0x27   :  { %s51_s7 = sshll.u32 %s142_s6, 4  ;;  %v39_v1 = vld [vmem:[#allocation5] sm:$0x3]  ;;  %v42_v2 = vld [vmem:[#allocation5 + $0x2] sm:$0x3]  ;;  %s52_s7 = int_to_ptr.vmem [resolvable:$true] %s51_s7 }
  0x28   :  { %v40_v3 = vmul.f32 %v39_v1, %v38_v0  ;;  %s110_s8 = scalar_lea.vmem %s52_s7, 32  ;;  %p115_p3 = scmp.lt.s32.totalorder %s52_s7, %s52_s7 }
  0x29   :  { %p111_p2 = scmp.ne.s32.totalorder %s52_s7, %s110_s8  ;;  %p116_p4 = scmp.lt.s32.totalorder %s110_s8, %s110_s8 }
  0x2a   :  { %v43_v4 = vadd.f32 %v42_v2, %v40_v3 }
  0x2b   :  { %p117_p5 = por %p116_p4, %p115_p3 }
  0x2c   :  { %44 = vst [vmem:[#allocation7] sm:$0x3] %v43_v4 }
  0x2d   :  { %p118_p6 = pnand %p117_p5, %p111_p2 }
  0x2f   :  { %121 = shalt.err (!%p118_p6)
}
  0x30   :  { %s122_s10 = scalar_lea.hbm %s203_s2, 32 }
  0x31   :  { %p123_p7 = scmp.ne.s32.totalorder %s203_s2, %s122_s10  ;;  %p126_p8 = scmp.lt.u32.totalorder %s122_s10, %s203_s2 }
  0x33   :  { %p128_p9 = pnand %p126_p8, %p123_p7 }
  0x35   :  { %131 = shalt.err (!%p128_p9)
}
  0x36   :  { %54 = dma.vmem_to_hbm [thread:$0]  %s52_s7, 32, %s203_s2, [#allocation4]  }
  0x37   :  { %136 = dma.done.wait [#allocation4], 32  }
  0x38   :  { %137 = vsyncadd [#allocation4], 4294967264 }
  0x39   :  { %58 = vsyncpa [#allocation3], 1 }
  0x3a   :  { %59 = vsyncpa [#allocation6], 1 }
  0x3b   :  { %60 = vsyncpa [#allocation4], 1 }

</bundles_post_ra>
